<compile_context>
chip_gen: v5e
topology: v5e:2x2
jax: 0.10.0
libtpu: 0.0.40
codegen_flags: <defaults>
</compile_context>

<pallas_src>
import math

import jax
import jax.numpy as jnp
from jax.experimental import pallas as pl
from jax.experimental.pallas import tpu as pltpu


def _pos_expand_kernel(x_ref, c_ref, out_ref):
    # x_ref:   (TR, k)      cumsum'd (optionally normalized) positions,
    #                       k consecutive sequence rows folded per output row
    # c_ref:   (k+1, k*F)   rows 0..k-1: 1/dim_t masked to its lane group
    #                       row  k     : phase (0 for even feat, pi/2 for odd)
    # out_ref: (TR, k*F)
    k = x_ref.shape[1]
    xt = x_ref[...]                              # (TR, k)
    pos = c_ref[k:k + 1, :]                      # phase row, (1, k*F)
    for j in range(k):                           # k <= 16, unrolled at trace time
        # (TR,1) * (1,k*F) broadcast multiply; other groups' lanes get exact 0
        pos = pos + xt[:, j:j + 1] * c_ref[j:j + 1, :]
    out_ref[...] = jnp.sin(pos).astype(out_ref.dtype)   # single transcendental


def position_embedding_sine(mask, num_pos_feats, temperature=10000.0,
                            normalize=False, scale=None,
                            out_dtype=jnp.float32):
    """mask: (B, L) bool. Returns (B, L, num_pos_feats) of `out_dtype`."""
    if scale is not None and not normalize:
        raise ValueError("normalize should be True if scale is passed")
    if scale is None:
        scale = 2 * math.pi

    B, L = mask.shape
    F = int(num_pos_feats)

    # --- O(B*L) prologue in plain JAX (cheap; keeps cumsum off the MXU/XLU) ---
    not_mask = jnp.logical_not(mask).astype(jnp.float32)
    x_embed = jnp.cumsum(not_mask, axis=1)                         # (B, L)
    if normalize:
        eps = 1e-6
        x_embed = x_embed / (x_embed[:, -1:] + eps) * jnp.float32(scale)

    n_rows = B * L

    # --- row fold: lane width k*F becomes a multiple of 128 (unmasked stores) ---
    k = 128 // math.gcd(F, 128)
    if k > 16 or (n_rows % k) != 0:
        k = 1                      # fallback: masked stores, still correct
    lane = k * F
    G = n_rows // k
    x_rows = x_embed.reshape(G, k)

    # --- fused constants: (k+1, lane) = [group-masked 1/dim_t ; phase] ---
    f_idx = jnp.arange(F, dtype=jnp.float32)
    exponent = 2.0 * jnp.floor(f_idx * 0.5) / float(F)
    inv_dim_t = 1.0 / (jnp.float32(temperature) ** exponent)        # (F,)
    phase = jnp.where((jnp.arange(F) % 2) == 1,
                      jnp.float32(math.pi / 2.0), jnp.float32(0.0))  # (F,)
    inv_tiled = jnp.tile(inv_dim_t, k)                               # (lane,)
    phase_tiled = jnp.tile(phase, k)                                 # (lane,)
    group_of_lane = jnp.repeat(jnp.arange(k), F)                     # (lane,)
    sel = (group_of_lane[None, :] == jnp.arange(k)[:, None]
           ).astype(jnp.float32) * inv_tiled[None, :]                # (k, lane)
    consts = jnp.concatenate([sel, phase_tiled[None, :]], axis=0)    # (k+1, lane)

    # --- tile sizing against an explicit VMEM budget (double-buffered) ---
    out_itemsize = jnp.dtype(out_dtype).itemsize
    x_pad_lane = max(k, 128)                      # k<128 pads to 128 lanes in VMEM
    bytes_per_row = 2 * lane * out_itemsize + 2 * x_pad_lane * 4
    VMEM_BUDGET = 8 << 20                         # << v5e's 16 MiB scoped default

    if G <= 8:
        tile_rows = G                             # single full-extent block
    else:
        tile_rows = max(8, (VMEM_BUDGET // bytes_per_row) // 8 * 8)
        # v7x megacore: guarantee several grid steps when there is enough work
        if G >= 32:
            tile_rows = min(tile_rows, max(8, (G // 4) // 8 * 8))
        elif G >= 16:
            tile_rows = min(tile_rows, max(8, (G // 2) // 8 * 8))
        tile_rows = min(tile_rows, (G // 8) * 8)
    grid = (pl.cdiv(G, tile_rows),)

    out = pl.pallas_call(
        _pos_expand_kernel,
        out_shape=jax.ShapeDtypeStruct((G, lane), out_dtype),
        grid=grid,
        in_specs=[
            pl.BlockSpec((tile_rows, k), lambda i: (i, 0)),
            pl.BlockSpec((k + 1, lane), lambda i: (0, 0)),   # resident constants
        ],
        out_specs=pl.BlockSpec((tile_rows, lane), lambda i: (i, 0)),
        compiler_params=pltpu.CompilerParams(
            dimension_semantics=("parallel",)),
    )(x_rows, consts)

    return out.reshape(B, L, F)


def _reference(mask, num_pos_feats, temperature=10000.0, normalize=False,
               scale=None):
    """Plain-JAX reference mirroring the PyTorch forward."""
    if scale is None:
        scale = 2 * math.pi
    not_mask = jnp.logical_not(mask)
    x_embed = jnp.cumsum(not_mask.astype(jnp.float32), axis=1)
    if normalize:
        eps = 1e-6
        x_embed = x_embed / (x_embed[:, -1:] + eps) * scale
    dim_t = jnp.arange(num_pos_feats, dtype=jnp.float32)
    dim_t = temperature ** (2.0 * jnp.floor(dim_t / 2.0) / num_pos_feats)
    pos_x = x_embed[:, :, None] / dim_t
    pos_x = jnp.stack((jnp.sin(pos_x[:, :, 0::2]),
                       jnp.cos(pos_x[:, :, 1::2])), axis=3)
    return pos_x.reshape(pos_x.shape[0], pos_x.shape[1], -1)


if __name__ == "__main__":
    B, L, F = 2, 16, 32
    key = jax.random.PRNGKey(0)
    mask = jax.random.bernoulli(key, p=0.3, shape=(B, L))  # (B, L) bool

    # default (no normalization), f32 parity with PyTorch
    out = jax.block_until_ready(position_embedding_sine(mask, num_pos_feats=F))
    ref = _reference(mask, num_pos_feats=F)
    assert out.shape == (B, L, F)
    assert out.dtype == jnp.float32
    assert jnp.allclose(out, ref, atol=1e-5, rtol=1e-5)

    # normalized path
    out_n = jax.block_until_ready(
        position_embedding_sine(mask, num_pos_feats=F, normalize=True))
    ref_n = _reference(mask, num_pos_feats=F, normalize=True)
    assert jnp.allclose(out_n, ref_n, atol=1e-5, rtol=1e-5)

    # optional bf16 output (halves HBM writeback on v5e/v6e); loose tolerance
    out_b = jax.block_until_ready(
        position_embedding_sine(mask, num_pos_feats=F, out_dtype=jnp.bfloat16))
    assert out_b.dtype == jnp.bfloat16
    assert jnp.allclose(out_b.astype(jnp.float32), ref, atol=2e-2)

    print("KERNEL_OK")
</pallas_src>

<mosaic_0001>
module attributes {stable_mosaic.version = 11 : i64} {
  func.func @_pos_expand_kernel(%arg0: i32, %arg1: memref<8x4xf32, #tpu.memory_space<vmem>>, %arg2: memref<5x128xf32, #tpu.memory_space<vmem>>, %arg3: memref<8x128xf32, #tpu.memory_space<vmem>>) attributes {dimension_semantics = [#tpu.dimension_semantics<parallel>], iteration_bounds = array<i64: 1>, scalar_prefetch = 0 : i64, scratch_operands = 0 : i64, tpu.core_type = #tpu.core_type<tc>, window_params = [{transform_indices = @transform_0, window_bounds = array<i64: 8, 4>}, {pipeline_mode = #tpu.pipeline_mode<synchronous>, transform_indices = @transform_1, window_bounds = array<i64: 5, 128>}, {transform_indices = @transform_2, window_bounds = array<i64: 8, 128>}]} {
    %c0 = arith.constant 0 : index
    %c0_0 = arith.constant 0 : index
    %0 = vector.load %arg1[%c0, %c0_0] : memref<8x4xf32, #tpu.memory_space<vmem>>, vector<8x4xf32>
    %c4 = arith.constant 4 : index
    %c0_1 = arith.constant 0 : index
    %1 = vector.load %arg2[%c4, %c0_1] : memref<5x128xf32, #tpu.memory_space<vmem>>, vector<1x128xf32>
    %2 = vector.extract_strided_slice %0 {offsets = [0, 0], sizes = [8, 1], strides = [1, 1]} : vector<8x4xf32> to vector<8x1xf32>
    %c0_2 = arith.constant 0 : index
    %c0_3 = arith.constant 0 : index
    %3 = vector.load %arg2[%c0_2, %c0_3] : memref<5x128xf32, #tpu.memory_space<vmem>>, vector<1x128xf32>
    %4 = vector.broadcast %2 : vector<8x1xf32> to vector<8x128xf32>
    %5 = vector.broadcast %3 : vector<1x128xf32> to vector<8x128xf32>
    %6 = arith.mulf %4, %5 : vector<8x128xf32>
    %7 = vector.broadcast %1 : vector<1x128xf32> to vector<8x128xf32>
    %8 = arith.addf %7, %6 : vector<8x128xf32>
    %9 = vector.extract_strided_slice %0 {offsets = [0, 1], sizes = [8, 1], strides = [1, 1]} : vector<8x4xf32> to vector<8x1xf32>
    %c1 = arith.constant 1 : index
    %c0_4 = arith.constant 0 : index
    %10 = vector.load %arg2[%c1, %c0_4] : memref<5x128xf32, #tpu.memory_space<vmem>>, vector<1x128xf32>
    %11 = vector.broadcast %9 : vector<8x1xf32> to vector<8x128xf32>
    %12 = vector.broadcast %10 : vector<1x128xf32> to vector<8x128xf32>
    %13 = arith.mulf %11, %12 : vector<8x128xf32>
    %14 = arith.addf %8, %13 : vector<8x128xf32>
    %15 = vector.extract_strided_slice %0 {offsets = [0, 2], sizes = [8, 1], strides = [1, 1]} : vector<8x4xf32> to vector<8x1xf32>
    %c2 = arith.constant 2 : index
    %c0_5 = arith.constant 0 : index
    %16 = vector.load %arg2[%c2, %c0_5] : memref<5x128xf32, #tpu.memory_space<vmem>>, vector<1x128xf32>
    %17 = vector.broadcast %15 : vector<8x1xf32> to vector<8x128xf32>
    %18 = vector.broadcast %16 : vector<1x128xf32> to vector<8x128xf32>
    %19 = arith.mulf %17, %18 : vector<8x128xf32>
    %20 = arith.addf %14, %19 : vector<8x128xf32>
    %21 = vector.extract_strided_slice %0 {offsets = [0, 3], sizes = [8, 1], strides = [1, 1]} : vector<8x4xf32> to vector<8x1xf32>
    %c3 = arith.constant 3 : index
    %c0_6 = arith.constant 0 : index
    %22 = vector.load %arg2[%c3, %c0_6] : memref<5x128xf32, #tpu.memory_space<vmem>>, vector<1x128xf32>
    %23 = vector.broadcast %21 : vector<8x1xf32> to vector<8x128xf32>
    %24 = vector.broadcast %22 : vector<1x128xf32> to vector<8x128xf32>
    %25 = arith.mulf %23, %24 : vector<8x128xf32>
    %26 = arith.addf %20, %25 : vector<8x128xf32>
    %27 = math.sin %26 : vector<8x128xf32>
    %c0_7 = arith.constant 0 : index
    %c0_8 = arith.constant 0 : index
    %28 = vector.load %arg3[%c0_7, %c0_8] : memref<8x128xf32, #tpu.memory_space<vmem>>, vector<8x128xf32>
    tpu.vector_store %arg3[%c0_7, %c0_8], %27 {strides = array<i32>} : memref<8x128xf32, #tpu.memory_space<vmem>>, vector<8x128xf32>,
    return
  }
  func.func @transform_0(%arg0: i32) -> (i32, i32) {
    %c0_i32 = arith.constant 0 : i32
    %c0_i32_0 = arith.constant 0 : i32
    return %arg0, %c0_i32 : i32, i32
  }
  func.func @transform_1(%arg0: i32) -> (i32, i32) {
    %c0_i32 = arith.constant 0 : i32
    %c0_i32_0 = arith.constant 0 : i32
    %c0_i32_1 = arith.constant 0 : i32
    return %c0_i32, %c0_i32_0 : i32, i32
  }
  func.func @transform_2(%arg0: i32) -> (i32, i32) {
    %c0_i32 = arith.constant 0 : i32
    %c0_i32_0 = arith.constant 0 : i32
    return %arg0, %c0_i32 : i32, i32
  }
}

</mosaic_0001>

<bundles_post_ra>
// kernel: tpu_custom_call.1
= control target key start
LH: loop header
LB: loop body
LE: loop exit
PB: predicated region body
PF: predicated region fallthrough
CT: control target
= control target key end

     0   :  { %v270_v1 = vmov 0   ;;  %v271_v2 = vmov 2   ;;  %s368_s0 = inlined_call_operand.vmem [shape: f32[8,4], index: 0, kind: input, shape index: {}]   ;;  %s369_s1 = inlined_call_operand.vmem [shape: f32[5,128], index: 1, kind: input, shape index: {}]   ;;  %s370_s2 = inlined_call_operand.hbm [shape: f32[8,128], index: 2, kind: output, shape index: {}]  }
   0x1   :  { %v12_v0 = vld [vmem:[%s368_s0] sm:$0xff]  ;;  %234 = vset.pattern.permute.xlu0 %v270_v1  ;;  %236 = vset.pattern.permute.xlu1 %v271_v2 }
   0x2   :  { %17 = vperm.xlu0 %234, %v12_v0   ;;  %34 = vperm.xlu1 %236, %v12_v0  }
   0x3   :  { %7 = vsyncpa [#allocation3], 0  ;;  %v272_v3 = vmov 1   ;;  %v273_v4 = vmov 3   ;;  %v239_v7 = vld [vmem:[%s369_s1] ss:$0 sm:$0xff] }
   0x4   :  { %v240_v8 = vld [vmem:[%s369_s1 + $0x4] ss:$0 sm:$0xff]  ;;  %v242_v10 = vld [vmem:[%s369_s1 + $0x1] ss:$0 sm:$0xff]  ;;  %v241_v11 = vld [vmem:[%s369_s1 + $0x2] ss:$0 sm:$0xff] }
   0x5   :  { %v243_v12 = vld [vmem:[%s369_s1 + $0x3] ss:$0 sm:$0xff]  ;;  %v274_v33 = vmov 683565275   ;;  %v275_v35 = vmov 2475754826  }
   0x6   :  { %v276_v37 = vmov 2131351028   ;;  %v277_v39 = vmov 2102212464   ;;  %v278_v44 = vmov 920167782  }
   0x7   :  { %v279_v47 = vmov 1326507024   ;;  %s280_s1 = smov [#allocation2]   ;;  %s211_s23 = sshll.u32 %s370_s2, 4  ;;  %s212_s23 = int_to_ptr.hbm [resolvable:$true] %s211_s23 }
   0x8   :  { %s209_s20 = sshll.u32 %s280_s1, 4  ;;  %s210_s20 = int_to_ptr.vmem [resolvable:$true] %s209_s20 }
   0xa   :  { %235 = vset.pattern.permute.xlu0 %v272_v3  ;;  %237 = vset.pattern.permute.xlu1 %v273_v4 }
   0xb   :  { %26 = vperm.xlu0 %235, %v12_v0   ;;  %42 = vperm.xlu1 %237, %v12_v0  }
  0x13   :  { %238 = vset.pattern.permute.xlu0 %v273_v4 }
  0x74   :  { %v18_v5 = vpop.permute.xlu0 %17  ;;  %v35_v6 = vpop.permute.xlu1 %34 }
  0x75   :  { %v21_v9 = vmul.f32 %v239_v7, %v18_v5  ;;  %v38_v17 = vmul.f32 %v241_v11, %v35_v6 }
  0x77   :  { %v23_v15 = vadd.f32 %v240_v8, %v21_v9 }
  0x7d   :  { %v27_v13 = vpop.permute.xlu0 %26  ;;  %v43_v14 = vpop.permute.xlu1 %42 }
  0x7e   :  { %v30_v16 = vmul.f32 %v242_v10, %v27_v13  ;;  %v46_v19 = vmul.f32 %v243_v12, %v43_v14 }
  0x80   :  { %v31_v18 = vadd.f32 %v30_v16, %v23_v15 }
  0x82   :  { %v39_v20 = vadd.f32 %v38_v17, %v31_v18 }
  0x84   :  { %v315_v21 = vadd.f32 %v46_v19, %v39_v20 }
  0x86   :  { %v51_v22 = vand.u32 2139095040, %v315_v21  ;;  %v48_v24 = vand.u32 2147483647, %v315_v21  ;;  %vm50_vm12 = vcmp.lt.s32.totalorder %v315_v21, 0 }
  0x88   :  { %v52_v23 = vshrl.u32 %v51_v22, 23  ;;  %v55_v27 = vand.u32 8388607, %v48_v24  ;;  %vm49_vm13 = vcmp.le.f32.partialorder %v48_v24, 0.7853982 }
  0x8a   :  { %v220_v25 = vadd.s32 4294967169, %v52_v23  ;;  %v56_v30 = vor.u32 8388608, %v55_v27 }
  0x8c   :  { %v58_v26 = vadd.s32 1, %v220_v25  ;;  %v323_v49 = vshll.u32 %v56_v30, 8 }
  0x8e   :  { %vm59_vm0 = vcmp.gt.s32.totalorder %v58_v26, 0  ;;  %v97_v61 = vand.u32 65535, %v323_v49  ;;  %v98_v63 = vshrl.u32 %v323_v49, 16 }
  0x8f   :  { %v60_v28 = vsel %vm59_vm0, %v58_v26, 0 }
  0x90   :  { %v62_v29 = vand.u32 31, %v60_v28  ;;  %v321_v31 = vshrl.u32 %v60_v28, 5 }
  0x92   :  { %v63_v32 = vsub.s32 32, %v62_v29  ;;  %v65_v34 = vshll.u32 %v274_v33, %v62_v29  ;;  %v68_v36 = vshll.u32 %v275_v35, %v62_v29  ;;  %v71_v38 = vshll.u32 %v276_v37, %v62_v29 }
  0x93   :  { %v74_v40 = vshll.u32 %v277_v39, %v62_v29  ;;  %v77_v46 = vshll.u32 %v278_v44, %v62_v29  ;;  %vm80_vm1 = vcmp.lt.s32.totalorder %v321_v31, 1  ;;  %vm83_vm2 = vcmp.lt.s32.totalorder %v321_v31, 4 }
  0x94   :  { %v66_v41 = vshrl.u32 %v275_v35, %v63_v32  ;;  %v69_v42 = vshrl.u32 %v276_v37, %v63_v32  ;;  %v72_v43 = vshrl.u32 %v277_v39, %v63_v32  ;;  %v75_v45 = vshrl.u32 %v278_v44, %v63_v32 }
  0x95   :  { %v78_v48 = vshrl.u32 %v279_v47, %v63_v32  ;;  %vm82_vm3 = vcmp.lt.s32.totalorder %v321_v31, 3  ;;  %vm81_vm4 = vcmp.lt.s32.totalorder %v321_v31, 2  ;;  %v64_v26 = vshrl.u32 %v274_v33, %v63_v32 }
  0x96   :  { %v67_v50 = vor.u32 %v66_v41, %v65_v34  ;;  %v70_v51 = vor.u32 %v69_v42, %v68_v36  ;;  %v73_v52 = vor.u32 %v72_v43, %v71_v38  ;;  %v76_v53 = vor.u32 %v75_v45, %v74_v40 }
  0x97   :  { %v79_v54 = vor.u32 %v78_v48, %v77_v46 }
  0x98   :  { %v88_v55 = vsel %vm80_vm1, %v67_v50, %v70_v51  ;;  %v89_v56 = vsel %vm83_vm2, %v76_v53, 920167782  ;;  %v92_v57 = vsel %vm80_vm1, %v70_v51, %v73_v52  ;;  %v85_v22 = vsel %vm83_vm2, %v73_v52, 2102212464 }
  0x99   :  { %v90_v58 = vsel %vm82_vm3, %v73_v52, %v89_v56  ;;  %v93_v59 = vsel %vm83_vm2, %v79_v54, 1326507024  ;;  %v84_v35 = vsel %vm80_vm1, %v64_v26, %v67_v50  ;;  %v86_v36 = vsel %vm82_vm3, %v70_v51, %v85_v22 }
  0x9a   :  { %v94_v60 = vsel %vm82_vm3, %v76_v53, %v93_v59  ;;  %v91_v62 = vsel %vm81_vm4, %v88_v55, %v90_v58  ;;  %v87_v33 = vsel %vm81_vm4, %v84_v35, %v86_v36  ;;  %vm191_vm1 = vweird.f32 %v315_v21 }
  0x9b   :  { %v95_v0 = vsel %vm81_vm4, %v92_v57, %v94_v60  ;;  %v121_v2 = vand.u32 65535, %v91_v62  ;;  %v122_v3 = vshrl.u32 %v91_v62, 16  ;;  %v141_v45 = vmul.u32 %v323_v49, %v87_v33 }
  0x9c   :  { %v99_v4 = vand.u32 65535, %v95_v0  ;;  %v100_v5 = vshrl.u32 %v95_v0, 16 }
  0x9d   :  { %v124_v6 = vmul.u32 %v122_v3, %v97_v61  ;;  %v125_v7 = vmul.u32 %v121_v2, %v98_v63  ;;  %v123_v10 = vmul.u32 %v121_v2, %v97_v61  ;;  %v126_v14 = vmul.u32 %v122_v3, %v98_v63 }
  0x9e   :  { %v102_v8 = vmul.u32 %v100_v5, %v97_v61  ;;  %v103_v9 = vmul.u32 %v99_v4, %v98_v63  ;;  %v101_v12 = vmul.u32 %v99_v4, %v97_v61  ;;  %v104_v15 = vmul.u32 %v100_v5, %v98_v63 }
  0x9f   :  { %v127_v11 = vshll.u32 %v124_v6, 16  ;;  %v129_v16 = vshll.u32 %v125_v7, 16  ;;  %v128_v30 = vshrl.u32 %v124_v6, 16  ;;  %v130_v39 = vshrl.u32 %v125_v7, 16 }
  0xa0   :  { %v105_v13 = vshll.u32 %v102_v8, 16  ;;  %v107_v18 = vshll.u32 %v103_v9, 16  ;;  %v106_v37 = vshrl.u32 %v102_v8, 16  ;;  %v108_v41 = vshrl.u32 %v103_v9, 16 }
  0xa1   :  { %vm131_vm5 = vc.u32 %v123_v10, %v127_v11  ;;  %v133_v17 = vadd.s32 %v127_v11, %v123_v10 }
  0xa2   :  { %vm109_vm6 = vc.u32 %v101_v12, %v105_v13  ;;  %v111_v19 = vadd.s32 %v105_v13, %v101_v12  ;;  %v132_v20 = vsel %vm131_vm5, 1, %v270_v1 }
  0xa3   :  { %v110_v23 = vsel %vm109_vm6, 1, %v270_v1  ;;  %v134_v25 = vadd.s32 %v132_v20, %v126_v14  ;;  %vm135_vm7 = vc.u32 %v133_v17, %v129_v16 }
  0xa4   :  { %v112_v27 = vadd.s32 %v110_v23, %v104_v15  ;;  %vm113_vm8 = vc.u32 %v111_v19, %v107_v18  ;;  %v136_v28 = vsel %vm135_vm7, 1, %v270_v1 }
  0xa5   :  { %v114_v29 = vsel %vm113_vm8, 1, %v270_v1  ;;  %v138_v34 = vadd.s32 %v136_v28, %v134_v25  ;;  %v137_v1 = vadd.s32 %v133_v17, %v129_v16 }
  0xa6   :  { %v116_v38 = vadd.s32 %v114_v29, %v112_v27 }
  0xa7   :  { %v139_v40 = vadd.s32 %v138_v34, %v128_v30 }
  0xa8   :  { %v117_v32 = vadd.s32 %v116_v38, %v106_v37 }
  0xa9   :  { %v140_v42 = vadd.s32 %v139_v40, %v130_v39 }
  0xaa   :  { %v118_v43 = vadd.s32 %v117_v32, %v108_v41 }
  0xab   :  { %v144_v44 = vadd.s32 1, %v140_v42 }
  0xac   :  { %vm143_vm9 = vc.u32 %v118_v43, %v137_v1  ;;  %v142_v57 = vadd.s32 %v137_v1, %v118_v43 }
  0xad   :  { %v145_v46 = vsel %vm143_vm9, %v144_v44, %v140_v42 }
  0xae   :  { %v146_v47 = vadd.s32 %v145_v46, %v141_v45 }
  0xb0   :  { %v147_v48 = vadd.s32 536870912, %v146_v47 }
  0xb2   :  { %v148_v50 = vshrl.u32 %v147_v48, 30 }
  0xb4   :  { %v149_v51 = vshll.u32 %v148_v50, 30  ;;  %v172_v7 = vsub.s32 4, %v148_v50 }
  0xb6   :  { %v150_v52 = vsub.s32 %v146_v47, %v149_v51  ;;  %v173_v12 = vsel %vm50_vm12, %v172_v7, %v148_v50 }
  0xb7   :  { %v175_v15 = vsel %vm49_vm13, 0, %v173_v12 }
  0xb8   :  { %vm151_vm10 = vcmp.lt.s32.totalorder %v150_v52, 0  ;;  %v152_v53 = vsub.s32 0, %v150_v52  ;;  %v192_v20 = vadd.s32 3, %v175_v15 }
  0xba   :  { %v153_v54 = vsel %vm151_vm10, %v152_v53, %v150_v52  ;;  %v193_v26 = vand.u32 3, %v192_v20 }
  0xbb   :  { %v154_v55 = vclz %v153_v54 }
  0xbc   :  { %vm195_vm14 = vcmp.eq.s32.totalorder %v193_v26, 0  ;;  %vm198_vm15 = vcmp.eq.s32.totalorder %v193_v26, 2  ;;  %vm194_vm0 = vcmp.lt.s32.totalorder %v193_v26, 2 }
  0xbd   :  { %v221_v56 = vadd.s32 4294967294, %v154_v55 }
  0xbf   :  { %vm222_vm11 = vcmp.lt.s32.totalorder %v221_v56, 0 }
  0xc0   :  { %v157_v31 = vsel %vm222_vm11, 0, %v221_v56 }
  0xc1   :  { %v158_v58 = vsub.s32 32, %v157_v31  ;;  %v162_v59 = vsub.s32 4294967266, %v157_v31  ;;  %v159_v60 = vshll.u32 %v150_v52, %v157_v31 }
  0xc3   :  { %v160_v61 = vshrl.u32 %v142_v57, %v158_v58  ;;  %v163_v49 = vadd.s32 127, %v162_v59 }
  0xc5   :  { %v161_v62 = vor.u32 %v160_v61, %v159_v60  ;;  %v164_v63 = vshll.u32 %v163_v49, 23 }
  0xc7   :  { %v165_v0 = vor.u32 4788187, %v164_v63  ;;  %v168_v3 = vcvt.s32.f32 %v161_v62 }
  0xc9   :  { %v166_v2 = vand.u32 2147483647, %v165_v0 }
  0xcb   :  { %v169_v4 = vmul.f32 %v168_v3, %v166_v2 }
  0xcd   :  { %v170_v5 = vxor.u32 2147483648, %v169_v4 }
  0xcf   :  { %v171_v6 = vsel %vm50_vm12, %v170_v5, %v169_v4 }
  0xd0   :  { %v174_v8 = vsel %vm49_vm13, %v315_v21, %v171_v6 }
  0xd1   :  { %v176_v9 = vmul.f32 %v174_v8, %v174_v8 }
  0xd3   :  { %v177_v10 = vmul.f32 -0.001358992, %v176_v9  ;;  %v184_v11 = vmul.f32 -0.00019511016, %v176_v9 }
  0xd5   :  { %v178_v13 = vadd.f32 0.041655596, %v177_v10  ;;  %v185_v14 = vadd.f32 0.008332121, %v184_v11 }
  0xd7   :  { %v179_v16 = vmul.f32 %v178_v13, %v176_v9  ;;  %v186_v17 = vmul.f32 %v185_v14, %v176_v9 }
  0xd9   :  { %v180_v18 = vadd.f32 -0.4999988, %v179_v16  ;;  %v187_v19 = vadd.f32 -0.16666654, %v186_v17 }
  0xdb   :  { %v181_v22 = vmul.f32 %v180_v18, %v176_v9  ;;  %v188_v23 = vmul.f32 %v187_v19, %v176_v9 }
  0xdd   :  { %v182_v25 = vadd.f32 1.0, %v181_v22  ;;  %v189_v24 = vadd.f32 1.0, %v188_v23 }
  0xdf   :  { %v190_v27 = vmul.f32 %v189_v24, %v174_v8  ;;  %v199_v28 = vxor.u32 2147483648, %v182_v25 }
  0xe1   :  { %v196_v29 = vxor.u32 2147483648, %v190_v27  ;;  %v200_v34 = vsel %vm198_vm15, %v199_v28, %v190_v27 }
  0xe3   :  { %v197_v30 = vsel %vm195_vm14, %v182_v25, %v196_v29 }
  0xe4   :  { %v201_v35 = vsel %vm194_vm0, %v197_v30, %v200_v34 }
  0xe5   :  { %v202_v36 = vsel %vm191_vm1, nan, %v201_v35 }
  0xe6   :  { %203 = vst [vmem:[#allocation2] sm:$0xff] %v202_v36 }
  0xe7   :  { %214 = dma.vmem_to_hbm [thread:$0]  %s210_s20, 128, %s212_s23, [#allocation3]  }
  0xe8   :  { %268 = dma.done.wait [#allocation3], 128  }
  0xe9   :  { %269 = vsyncadd [#allocation3], 4294967168 }
  0xea   :  { %219 = vsyncpa [#allocation3], 1 }

</bundles_post_ra>
